<compile_context>
chip_gen: v5e
topology: v5e:2x2
jax: 0.10.0
libtpu: 0.0.40
codegen_flags: <defaults>
</compile_context>

<pallas_src>
import jax
import jax.numpy as jnp
from jax.experimental import pallas as pl
from jax.experimental.pallas import tpu as pltpu


def _make_se_kernel(C, Cr, HW):
    inv_hw = 1.0 / float(HW)  # true spatial size; zero lane-padding doesn't affect the sum

    def kernel(x_ref, w_ref, o_ref):
        # x_ref : (Nb, C, HWp)  activations, lane-dense (HWp % 128 == 0)
        # w_ref : (2C, Cr) f32  rows [0:C] = W1^T, rows [C:2C] = W2
        # ------------------------------------------------------------------
        # Squeeze: global average pool over the spatial (lane) axis.
        # Stream x through the f32 reduce; do not keep an f32 copy of x live
        # across all stages (would spill vregs at large HW).
        pooled = jnp.sum(x_ref[...].astype(jnp.float32), axis=2,
                         keepdims=True) * inv_hw               # (Nb, C, 1)

        w = w_ref[...]                                          # (2C, Cr) f32
        w1 = w[:C]                                              # (C, Cr) = W1^T
        w2 = w[C:]                                              # (C, Cr) = W2

        # FC1: h[n, j] = sum_c W1[j, c] * pooled[n, c]   (VPU mul + sublane reduce)
        h = jnp.sum(w1[None] * pooled, axis=1, keepdims=True)   # (Nb, 1, Cr)
        # TODO(synk): PyTorch nn.GELU() defaults to the exact erf form; tanh
        # approximation used here (~1e-3 on the gate, attenuated by sigmoid).
        h = jax.nn.gelu(h, approximate=True)

        # FC2: s[n, c] = sum_j W2[c, j] * h[n, j]        (VPU mul + lane reduce)
        s = jnp.sum(w2[None] * h, axis=2, keepdims=True)        # (Nb, C, 1)
        s = jax.nn.sigmoid(s)

        # Excite: channel scale.  Fresh VMEM read of x (loads are nearly free,
        # 3 vld slots/cycle); multiply stays in the input dtype.
        o_ref[...] = x_ref[...] * s.astype(o_ref.dtype)

    return kernel


def _pick_batch_block(N, bytes_per_n):
    """Batch elements per grid step (per-step input block targets ~4 MiB)."""
    TARGET = 4 << 20
    nb = int(max(1, min(N, TARGET // max(bytes_per_n, 1))))
    # v7x megacore: keep >=2 parallel grid steps only when each half still
    # moves a non-trivial amount of data; otherwise one step wins.
    if nb == N and N >= 2 and (N // 2) * bytes_per_n >= (512 << 10):
        nb = -(-N // 2)
    # Keep the grid exact (no partially-OOB trailing block).
    while N % nb:
        nb -= 1
    return nb


def se_forward(x, w1_pt, w2_pt):
    """Squeeze-and-excitation forward (fused Pallas kernel).

    x     : (N, C, H, W)  activations (NCHW, PyTorch layout)
    w1_pt : (Cr, C)       fc[0].weight of Linear(oup -> int(inp*expansion), bias=False)
    w2_pt : (C, Cr)       fc[2].weight of Linear(int(inp*expansion) -> oup, bias=False)
    """
    N, C, H, W = x.shape
    Cr = w1_pt.shape[0]
    HW = H * W
    HWp = ((HW + 127) // 128) * 128      # keep the output lane axis dense

    x2 = x.reshape(N, C, HW)             # free for contiguous NCHW
    if HWp != HW:
        # Zero lane-padding: keeps stores unmasked; zeros do not perturb the
        # pooled sum (we divide by the true HW) and padded columns are sliced off.
        x2 = jnp.pad(x2, ((0, 0), (0, 0), (0, HWp - HW)))

    # One combined, pre-cast f32 weight slab: rows [0:C] = W1^T, rows [C:] = W2.
    w_cat = jnp.concatenate(
        [w1_pt.T.astype(jnp.float32), w2_pt.astype(jnp.float32)], axis=0)  # (2C, Cr)

    nb = _pick_batch_block(N, C * HWp * x.dtype.itemsize)
    grid = (N // nb,)

    kernel = _make_se_kernel(C, Cr, HW)
    out = pl.pallas_call(
        kernel,
        out_shape=jax.ShapeDtypeStruct((N, C, HWp), x.dtype),
        grid_spec=pltpu.PrefetchScalarGridSpec(
            num_scalar_prefetch=0,
            grid=grid,
            in_specs=[
                pl.BlockSpec((nb, C, HWp), lambda n: (n, 0, 0)),
                pl.BlockSpec((2 * C, Cr), lambda n: (0, 0)),   # resident weights
            ],
            out_specs=pl.BlockSpec((nb, C, HWp), lambda n: (n, 0, 0)),
        ),
        compiler_params=pltpu.CompilerParams(
            dimension_semantics=("parallel",)),
        cost_estimate=pl.CostEstimate(
            flops=2 * N * C * HW + 4 * N * C * Cr,
            transcendentals=N * (C + Cr),
            bytes_accessed=2 * N * C * HWp * x.dtype.itemsize + 2 * C * Cr * 4),
        # NOTE: if the caller no longer needs x, input_output_aliases={0: 0}
        # would let the output reuse x's HBM buffer (memory, not bandwidth).
    )(x2, w_cat)

    if HWp != HW:
        out = out[:, :, :HW]
    return out.reshape(N, C, H, W)


# ----------------------------------------------------------------------------
# Pure-JAX reference (matches PyTorch SE.forward; same tanh-approx GELU).
# ----------------------------------------------------------------------------
def se_ref(x, w1_pt, w2_pt):
    pooled = jnp.mean(x, axis=(2, 3))                        # (N, C)
    h = jax.nn.gelu(pooled @ w1_pt.T, approximate=True)      # (N, Cr)
    s = jax.nn.sigmoid(h @ w2_pt.T)                          # (N, C)
    return x * s[:, :, None, None]


if __name__ == "__main__":
    # SE(inp=C, oup=C, expansion=0.25)  ->  hidden = C // 4
    N, C, H, W = 2, 32, 16, 16
    expansion = 0.25
    Cr = int(C * expansion)

    key = jax.random.PRNGKey(0)
    kx, k1, k2 = jax.random.split(key, 3)
    x = jax.random.normal(kx, (N, C, H, W), jnp.float32)           # NCHW
    w1_pt = 0.1 * jax.random.normal(k1, (Cr, C), jnp.float32)      # fc[0].weight
    w2_pt = 0.1 * jax.random.normal(k2, (C, Cr), jnp.float32)      # fc[2].weight

    out = jax.block_until_ready(se_forward(x, w1_pt, w2_pt))
    ref = jax.block_until_ready(se_ref(x, w1_pt, w2_pt))

    assert out.shape == (N, C, H, W)
    err = float(jnp.max(jnp.abs(out - ref)))
    assert jnp.allclose(out, ref, rtol=1e-5, atol=1e-5), err
    print("KERNEL_OK")
</pallas_src>

<mosaic_0001>
module attributes {stable_mosaic.version = 11 : i64} {
  func.func @kernel(%arg0: i32, %arg1: memref<2x32x256xf32, #tpu.memory_space<vmem>>, %arg2: memref<64x8xf32, #tpu.memory_space<vmem>>, %arg3: memref<2x32x256xf32, #tpu.memory_space<vmem>>) attributes {dimension_semantics = [#tpu.dimension_semantics<parallel>], iteration_bounds = array<i64: 1>, scalar_prefetch = 0 : i64, scratch_operands = 0 : i64, tpu.core_type = #tpu.core_type<tc>, window_params = [{transform_indices = @transform_0, window_bounds = array<i64: 2, 32, 256>}, {pipeline_mode = #tpu.pipeline_mode<synchronous>, transform_indices = @transform_1, window_bounds = array<i64: 64, 8>}, {transform_indices = @transform_2, window_bounds = array<i64: 2, 32, 256>}]} {
    %c0 = arith.constant 0 : index
    %c0_0 = arith.constant 0 : index
    %c0_1 = arith.constant 0 : index
    %0 = vector.load %arg1[%c0, %c0_0, %c0_1] : memref<2x32x256xf32, #tpu.memory_space<vmem>>, vector<2x32x256xf32>
    %cst = arith.constant dense<0.000000e+00> : vector<2x32xf32>
    %1 = vector.multi_reduction <add>, %0, %cst [2] : vector<2x32x256xf32> to vector<2x32xf32>
    %2 = vector.shape_cast %1 : vector<2x32xf32> to vector<2x32x1xf32>
    %cst_2 = arith.constant 3.906250e-03 : f32
    %3 = vector.broadcast %cst_2 : f32 to vector<2x32x1xf32>
    %4 = arith.mulf %2, %3 : vector<2x32x1xf32>
    %c0_3 = arith.constant 0 : index
    %c0_4 = arith.constant 0 : index
    %5 = vector.load %arg2[%c0_3, %c0_4] : memref<64x8xf32, #tpu.memory_space<vmem>>, vector<64x8xf32>
    %6 = vector.extract_strided_slice %5 {offsets = [0, 0], sizes = [32, 8], strides = [1, 1]} : vector<64x8xf32> to vector<32x8xf32>
    %7 = vector.extract_strided_slice %5 {offsets = [32, 0], sizes = [32, 8], strides = [1, 1]} : vector<64x8xf32> to vector<32x8xf32>
    %8 = vector.shape_cast %6 : vector<32x8xf32> to vector<1x32x8xf32>
    %9 = vector.broadcast %8 : vector<1x32x8xf32> to vector<2x32x8xf32>
    %10 = vector.broadcast %4 : vector<2x32x1xf32> to vector<2x32x8xf32>
    %11 = arith.mulf %9, %10 : vector<2x32x8xf32>
    %cst_5 = arith.constant dense<0.000000e+00> : vector<2x8xf32>
    %12 = vector.multi_reduction <add>, %11, %cst_5 [1] : vector<2x32x8xf32> to vector<2x8xf32>
    %13 = vector.shape_cast %12 : vector<2x8xf32> to vector<2x1x8xf32>
    %14 = arith.mulf %13, %13 : vector<2x1x8xf32>
    %15 = arith.mulf %13, %14 : vector<2x1x8xf32>
    %cst_6 = arith.constant 4.471500e-02 : f32
    %16 = vector.broadcast %cst_6 : f32 to vector<2x1x8xf32>
    %17 = arith.mulf %16, %15 : vector<2x1x8xf32>
    %18 = arith.addf %13, %17 : vector<2x1x8xf32>
    %cst_7 = arith.constant 0.797884583 : f32
    %19 = vector.broadcast %cst_7 : f32 to vector<2x1x8xf32>
    %20 = arith.mulf %19, %18 : vector<2x1x8xf32>
    %21 = math.tanh %20 : vector<2x1x8xf32>
    %cst_8 = arith.constant 1.000000e+00 : f32
    %22 = vector.broadcast %cst_8 : f32 to vector<2x1x8xf32>
    %23 = arith.addf %22, %21 : vector<2x1x8xf32>
    %cst_9 = arith.constant 5.000000e-01 : f32
    %24 = vector.broadcast %cst_9 : f32 to vector<2x1x8xf32>
    %25 = arith.mulf %24, %23 : vector<2x1x8xf32>
    %26 = arith.mulf %13, %25 : vector<2x1x8xf32>
    %27 = vector.shape_cast %7 : vector<32x8xf32> to vector<1x32x8xf32>
    %28 = vector.broadcast %27 : vector<1x32x8xf32> to vector<2x32x8xf32>
    %29 = vector.broadcast %26 : vector<2x1x8xf32> to vector<2x32x8xf32>
    %30 = arith.mulf %28, %29 : vector<2x32x8xf32>
    %cst_10 = arith.constant dense<0.000000e+00> : vector<2x32xf32>
    %31 = vector.multi_reduction <add>, %30, %cst_10 [2] : vector<2x32x8xf32> to vector<2x32xf32>
    %32 = vector.shape_cast %31 : vector<2x32xf32> to vector<2x32x1xf32>
    %33 = arith.negf %32 : vector<2x32x1xf32>
    %34 = math.exp %33 : vector<2x32x1xf32>
    %cst_11 = arith.constant 1.000000e+00 : f32
    %35 = vector.broadcast %cst_11 : f32 to vector<2x32x1xf32>
    %36 = arith.addf %35, %34 : vector<2x32x1xf32>
    %37 = arith.divf %35, %36 : vector<2x32x1xf32>
    %c0_12 = arith.constant 0 : index
    %c0_13 = arith.constant 0 : index
    %c0_14 = arith.constant 0 : index
    %38 = vector.load %arg1[%c0_12, %c0_13, %c0_14] : memref<2x32x256xf32, #tpu.memory_space<vmem>>, vector<2x32x256xf32>
    %39 = vector.broadcast %37 : vector<2x32x1xf32> to vector<2x32x256xf32>
    %40 = arith.mulf %38, %39 : vector<2x32x256xf32>
    %c0_15 = arith.constant 0 : index
    %c0_16 = arith.constant 0 : index
    %c0_17 = arith.constant 0 : index
    %41 = vector.load %arg3[%c0_15, %c0_16, %c0_17] : memref<2x32x256xf32, #tpu.memory_space<vmem>>, vector<2x32x256xf32>
    tpu.vector_store %arg3[%c0_15, %c0_16, %c0_17], %40 {strides = array<i32>} : memref<2x32x256xf32, #tpu.memory_space<vmem>>, vector<2x32x256xf32>,
    return
  }
  func.func @transform_0(%arg0: i32) -> (i32, i32, i32) {
    %c0_i32 = arith.constant 0 : i32
    %c0_i32_0 = arith.constant 0 : i32
    %c0_i32_1 = arith.constant 0 : i32
    return %arg0, %c0_i32, %c0_i32_0 : i32, i32, i32
  }
  func.func @transform_1(%arg0: i32) -> (i32, i32) {
    %c0_i32 = arith.constant 0 : i32
    %c0_i32_0 = arith.constant 0 : i32
    %c0_i32_1 = arith.constant 0 : i32
    return %c0_i32, %c0_i32_0 : i32, i32
  }
  func.func @transform_2(%arg0: i32) -> (i32, i32, i32) {
    %c0_i32 = arith.constant 0 : i32
    %c0_i32_0 = arith.constant 0 : i32
    %c0_i32_1 = arith.constant 0 : i32
    return %arg0, %c0_i32, %c0_i32_0 : i32, i32, i32
  }
}

</mosaic_0001>

<bundles_post_ra>
// kernel: tpu_custom_call.1
= control target key start
LH: loop header
LB: loop body
LE: loop exit
PB: predicated region body
PF: predicated region fallthrough
CT: control target
= control target key end

     0   :  { %7 = vsyncpa [#allocation3], 0  ;;  %s683_s0 = inlined_call_operand.hbm [shape: f32[2,32,256], index: 0, kind: input, shape index: {}]   ;;  %s684_s1 = inlined_call_operand.vmem [shape: f32[64,8], index: 1, kind: input, shape index: {}]   ;;  %s685_s2 = inlined_call_operand.hbm [shape: f32[2,32,256], index: 2, kind: output, shape index: {}]  }
   0x1   :  { %8 = vsyncpa [#allocation4], 0  ;;  %s13_s11 = sshll.u32 %s683_s0, 4  ;;  %s472_s12 = smov [#allocation2]   ;;  %s14_s11 = int_to_ptr.hbm [resolvable:$true] %s13_s11 }
   0x2   :  { %s15_s13 = sshll.u32 %s472_s12, 4  ;;  %s473_s14 = smov 256   ;;  %s16_s13 = int_to_ptr.vmem [resolvable:$true] %s15_s13 }
   0x3   :  { %s474_s15 = smov 16  }
   0x4   :  { %21 = dma.hbm_to_vmem [thread:$0]  %s14_s11, 2048, %s16_s13, [#allocation3], %s473_s14, %s473_s14, %s474_s15  }
   0x5   :  { %468 = dma.done.wait [#allocation3], 2048  }
   0x6   :  { %469 = vsyncadd [#allocation3], 4294965248  ;;  %v497_v0 = vld [vmem:[#allocation2 + $0x40] sm:$0xff]  ;;  %v499_v1 = vld [vmem:[#allocation2 + $0x48] sm:$0xff]  ;;  %vm92_vm0 = vcmask 64512   ;;  %s359_s6 = sshll.u32 %s685_s2, 4  ;;  %s360_s6 = int_to_ptr.hbm [resolvable:$true] %s359_s6 }
   0x7   :  { %v501_v2 = vld [vmem:[#allocation2] sm:$0xff]  ;;  %v56_v3 = vadd.f32 %v499_v1, %v497_v0  ;;  %v505_v4 = vld [vmem:[#allocation2 + $0x8] sm:$0xff]  ;;  %v515_v9 = vld [vmem:[#allocation2 + $0x50] sm:$0xff] }
   0x8   :  { %v507_v5 = vld [vmem:[#allocation2 + $0x20] sm:$0xff]  ;;  %v509_v6 = vld [vmem:[#allocation2 + $0x28] sm:$0xff]  ;;  %v44_v7 = vadd.f32 %v505_v4, %v501_v2  ;;  %v517_v10 = vld [vmem:[#allocation2 + $0x58] sm:$0xff] }
   0x9   :  { %v50_v8 = vadd.f32 %v509_v6, %v507_v5  ;;  %57 = vadd.xlane.f32.xlu1 %v56_v3  ;;  %v519_v11 = vld [vmem:[#allocation2 + $0x10] sm:$0xff]  ;;  %v521_v12 = vld [vmem:[#allocation2 + $0x18] sm:$0xff]  ;;  %v523_v13 = vld [vmem:[#allocation2 + $0x60] sm:$0xff]  ;;  %v59_v15 = vadd.f32 %v517_v10, %v515_v9 }
   0xa   :  { %45 = vadd.xlane.f32.xlu0 %v44_v7  ;;  %v525_v14 = vld [vmem:[#allocation2 + $0x68] sm:$0xff]  ;;  %v47_v16 = vadd.f32 %v521_v12, %v519_v11  ;;  %v533_v18 = vld [vmem:[#allocation2 + $0x70] sm:$0xff]  ;;  %v535_v19 = vld [vmem:[#allocation2 + $0x78] sm:$0xff] }
   0xb   :  { %51 = vadd.xlane.f32.xlu2 %v50_v8  ;;  %v62_v17 = vadd.f32 %v525_v14, %v523_v13  ;;  %v537_v20 = vld [vmem:[#allocation2 + $0x30] sm:$0xff]  ;;  %v539_v21 = vld [vmem:[#allocation2 + $0x38] sm:$0xff]  ;;  %v65_v22 = vadd.f32 %v535_v19, %v533_v18  ;;  %v76_v28 = vld [vmem:[%s684_s1] sm:$0xff] }
   0xc   :  { %v53_v23 = vadd.f32 %v539_v21, %v537_v20  ;;  %v77_v30 = vld [vmem:[%s684_s1 + $0x8] sm:$0xff]  ;;  %v78_v36 = vld [vmem:[%s684_s1 + $0x10] sm:$0xff]  ;;  %v79_v50 = vld [vmem:[%s684_s1 + $0x18] sm:$0xff] }
  0x11   :  { %60 = vadd.xlane.f32.xlu1 %v59_v15 }
  0x12   :  { %48 = vadd.xlane.f32.xlu0 %v47_v16 }
  0x13   :  { %63 = vadd.xlane.f32.xlu2 %v62_v17 }
  0x19   :  { %66 = vadd.xlane.f32.xlu1 %v65_v22 }
  0x1a   :  { %54 = vadd.xlane.f32.xlu0 %v53_v23 }
  0x7c   :  { %v58_v24 = vpop.xlane.xlu1 %57 }
  0x7d   :  { %v46_v25 = vpop.xlane.xlu0 %45  ;;  %v72_v27 = vmul.f32 0.00390625, %v58_v24 }
  0x7e   :  { %v52_v26 = vpop.xlane.xlu2 %51  ;;  %v68_v29 = vmul.f32 0.00390625, %v46_v25 }
  0x7f   :  { %v88_v32 = vmul.f32 %v76_v28, %v72_v27  ;;  %v70_v37 = vmul.f32 0.00390625, %v52_v26 }
  0x80   :  { %v84_v41 = vmul.f32 %v76_v28, %v68_v29 }
  0x81   :  { %v106_v43 = vsel %vm92_vm0, %v88_v32, 0.0  ;;  %v86_v46 = vmul.f32 %v78_v36, %v70_v37 }
  0x82   :  { %v93_v48 = vsel %vm92_vm0, %v84_v41, 0.0 }
  0x83   :  { %v96_v56 = vsel %vm92_vm0, %v86_v46, 0.0  ;;  %v81_v46 = vld [vmem:[%s684_s1 + $0x28] sm:$0xff] }
  0x84   :  { %v61_v31 = vpop.xlane.xlu1 %60 }
  0x85   :  { %v73_v33 = vmul.f32 0.00390625, %v61_v31  ;;  %v49_v34 = vpop.xlane.xlu0 %48 }
  0x86   :  { %v64_v35 = vpop.xlane.xlu2 %63  ;;  %v69_v38 = vmul.f32 0.00390625, %v49_v34 }
  0x87   :  { %v74_v39 = vmul.f32 0.00390625, %v64_v35  ;;  %v89_v40 = vmul.f32 %v77_v30, %v73_v33 }
  0x88   :  { %v85_v42 = vmul.f32 %v77_v30, %v69_v38 }
  0x89   :  { %v107_v44 = vsel %vm92_vm0, %v89_v40, 0.0  ;;  %v90_v45 = vmul.f32 %v78_v36, %v74_v39 }
  0x8a   :  { %v94_v47 = vsel %vm92_vm0, %v85_v42, 0.0  ;;  %v108_v49 = vadd.f32 %v107_v44, %v106_v43 }
  0x8b   :  { %v95_v52 = vadd.f32 %v94_v47, %v93_v48  ;;  %v109_v53 = vsel %vm92_vm0, %v90_v45, 0.0  ;;  %v82_v45 = vld [vmem:[%s684_s1 + $0x30] sm:$0xff]  ;;  %v80_v47 = vld [vmem:[%s684_s1 + $0x20] sm:$0xff] }
  0x8c   :  { %v67_v51 = vpop.xlane.xlu1 %66  ;;  %v110_v59 = vadd.f32 %v109_v53, %v108_v49 }
  0x8d   :  { %v75_v54 = vmul.f32 0.00390625, %v67_v51  ;;  %v55_v55 = vpop.xlane.xlu0 %54  ;;  %v97_v62 = vadd.f32 %v96_v56, %v95_v52 }
  0x8e   :  { %v71_v57 = vmul.f32 0.00390625, %v55_v55 }
  0x8f   :  { %v91_v58 = vmul.f32 %v79_v50, %v75_v54 }
  0x90   :  { %v87_v60 = vmul.f32 %v79_v50, %v71_v57  ;;  %v83_v57 = vld [vmem:[%s684_s1 + $0x38] sm:$0xff]  ;;  %s475_s1 = smov [#allocation5]  }
  0x91   :  { %v111_v61 = vsel %vm92_vm0, %v91_v58, 0.0  ;;  %s357_s3 = sshll.u32 %s475_s1, 4  ;;  %s358_s3 = int_to_ptr.vmem [resolvable:$true] %s357_s3 }
  0x92   :  { %v112_v63 = vadd.f32 %v111_v61, %v110_v59  ;;  %v98_v3 = vsel %vm92_vm0, %v87_v60, 0.0 }
  0x93   :  { %v99_v7 = vadd.f32 %v98_v3, %v97_v62 }
  0x94   :  { %v113_v8 = vrot.slane %v112_v63, 4 }
  0x95   :  { %v100_v15 = vrot.slane %v99_v7, 4 }
  0x96   :  { %v114_v16 = vadd.f32 %v113_v8, %v112_v63 }
  0x97   :  { %v101_v17 = vadd.f32 %v100_v15, %v99_v7 }
  0x98   :  { %v115_v22 = vrot.slane %v114_v16, 2 }
  0x99   :  { %v102_v23 = vrot.slane %v101_v17, 2 }
  0x9a   :  { %v116_v24 = vadd.f32 %v115_v22, %v114_v16 }
  0x9b   :  { %v103_v25 = vadd.f32 %v102_v23, %v101_v17 }
  0x9c   :  { %v117_v26 = vrot.slane %v116_v24, 1 }
  0x9d   :  { %v104_v27 = vrot.slane %v103_v25, 1 }
  0x9e   :  { %v118_v28 = vadd.f32 %v117_v26, %v116_v24 }
  0x9f   :  { %v105_v29 = vadd.f32 %v104_v27, %v103_v25 }
  0xa0   :  { %v120_v30 = vmul.f32 %v118_v28, %v118_v28 }
  0xa1   :  { %v119_v31 = vmul.f32 %v105_v29, %v105_v29 }
  0xa2   :  { %v122_v32 = vmul.f32 %v120_v30, %v118_v28 }
  0xa3   :  { %v121_v33 = vmul.f32 %v119_v31, %v105_v29 }
  0xa4   :  { %v124_v34 = vmul.f32 0.044715, %v122_v32 }
  0xa5   :  { %v123_v35 = vmul.f32 0.044715, %v121_v33 }
  0xa6   :  { %v126_v36 = vadd.f32 %v124_v34, %v118_v28 }
  0xa7   :  { %v125_v37 = vadd.f32 %v123_v35, %v105_v29 }
  0xa8   :  { %v128_v38 = vmul.f32 0.7978846, %v126_v36 }
  0xa9   :  { %v127_v39 = vmul.f32 0.7978846, %v125_v37 }
  0xaa   :  { %384 = vtanh.f32 %v128_v38 }
  0xab   :  { %386 = vtanh.f32 %v127_v39 }
  0xb0   :  { %v385_v40 = vpop.eup %384 }
  0xb1   :  { %v387_v41 = vpop.eup %386  ;;  %v132_v43 = vadd.f32 1.0, %v385_v40 }
  0xb2   :  { %v131_v42 = vadd.f32 1.0, %v387_v41 }
  0xb3   :  { %v134_v49 = vmul.f32 0.5, %v132_v43 }
  0xb4   :  { %v133_v44 = vmul.f32 0.5, %v131_v42 }
  0xb5   :  { %v136_v56 = vmul.f32 %v134_v49, %v118_v28 }
  0xb6   :  { %v135_v48 = vmul.f32 %v133_v44, %v105_v29 }
  0xb7   :  { %v142_v58 = vmul.f32 %v136_v56, %v81_v46  ;;  %v141_v59 = vmul.f32 %v136_v56, %v80_v47  ;;  %v144_v3 = vmul.f32 %v136_v56, %v83_v57  ;;  %v143_v7 = vmul.f32 %v136_v56, %v82_v45 }
  0xb8   :  { %v139_v50 = vmul.f32 %v135_v48, %v82_v45  ;;  %v138_v51 = vmul.f32 %v135_v48, %v81_v46  ;;  %v137_v52 = vmul.f32 %v135_v48, %v80_v47  ;;  %v140_v60 = vmul.f32 %v135_v48, %v83_v57 }
  0xb9   :  { %v160_v61 = vsel %vm92_vm0, %v142_v58, 0.0  ;;  %v157_v62 = vsel %vm92_vm0, %v141_v59, 0.0  ;;  %v166_v8 = vsel %vm92_vm0, %v144_v3, 0.0  ;;  %v163_v15 = vsel %vm92_vm0, %v143_v7, 0.0 }
  0xba   :  { %v151_v53 = vsel %vm92_vm0, %v139_v50, 0.0  ;;  %v148_v54 = vsel %vm92_vm0, %v138_v51, 0.0  ;;  %v145_v55 = vsel %vm92_vm0, %v137_v52, 0.0  ;;  %v154_v63 = vsel %vm92_vm0, %v140_v60, 0.0 }
  0xbb   :  { %152 = vadd.xlane.f32.xlu1 %v151_v53  ;;  %149 = vadd.xlane.f32.xlu0 %v148_v54 }
  0xbc   :  { %146 = vadd.xlane.f32.xlu2 %v145_v55 }
  0xc3   :  { %161 = vadd.xlane.f32.xlu1 %v160_v61  ;;  %158 = vadd.xlane.f32.xlu0 %v157_v62 }
  0xc4   :  { %155 = vadd.xlane.f32.xlu2 %v154_v63 }
  0xcb   :  { %167 = vadd.xlane.f32.xlu0 %v166_v8 }
  0xcc   :  { %164 = vadd.xlane.f32.xlu2 %v163_v15 }
 0x12e   :  { %v153_v16 = vpop.xlane.xlu1 %152  ;;  %v150_v17 = vpop.xlane.xlu0 %149 }
 0x12f   :  { %v374_v22 = vmul.f32 -1.442695, %v153_v16  ;;  %v373_v23 = vmul.f32 -1.442695, %v150_v17  ;;  %v147_v24 = vpop.xlane.xlu2 %146 }
 0x130   :  { %v372_v25 = vmul.f32 -1.442695, %v147_v24 }
 0x131   :  { %388 = vpow2.f32 %v374_v22 }
 0x132   :  { %390 = vpow2.f32 %v373_v23 }
 0x133   :  { %392 = vpow2.f32 %v372_v25 }
 0x136   :  { %v162_v26 = vpop.xlane.xlu1 %161  ;;  %v159_v27 = vpop.xlane.xlu0 %158 }
 0x137   :  { %v389_v28 = vpop.eup %388  ;;  %v377_v29 = vmul.f32 -1.442695, %v162_v26  ;;  %v156_v30 = vpop.xlane.xlu2 %155  ;;  %v376_v33 = vmul.f32 -1.442695, %v159_v27 }
 0x138   :  { %v391_v31 = vpop.eup %390  ;;  %v195_v32 = vadd.f32 1.0, %v389_v28  ;;  %v375_v36 = vmul.f32 -1.442695, %v156_v30 }
 0x139   :  { %v393_v34 = vpop.eup %392  ;;  %v194_v35 = vadd.f32 1.0, %v391_v31  ;;  %394 = vpow2.f32 %v377_v29 }
 0x13a   :  { %396 = vrcp.f32 %v195_v32  ;;  %v585_v37 = vadd.f32 1.0, %v393_v34  ;;  %v240_v38 = vand.u32 2147483647, %v195_v32  ;;  %v242_v39 = vand.u32 2147483648, %v195_v32 }
 0x13b   :  { %398 = vrcp.f32 %v194_v35  ;;  %v225_v42 = vand.u32 2147483647, %v194_v35  ;;  %v227_v45 = vand.u32 2147483648, %v194_v35  ;;  %vm236_vm1 = vweird.f32 %v195_v32 }
 0x13c   :  { %400 = vpow2.f32 %v376_v33  ;;  %vm221_vm2 = vweird.f32 %v194_v35  ;;  %vm590_vm3 = vcmp.eq.f32.partialorder %v240_v38, 8.507059e+37  ;;  %v243_v53 = vor.u32 1.1754944e-38, %v242_v39 }
 0x13d   :  { %402 = vpow2.f32 %v375_v36  ;;  %vm595_vm4 = vcmp.eq.f32.partialorder %v225_v42, 8.507059e+37  ;;  %v210_v58 = vand.u32 2147483647, %v585_v37  ;;  %v228_v62 = vor.u32 1.1754944e-38, %v227_v45 }
 0x13e   :  { %404 = vrcp.f32 %v585_v37  ;;  %v168_v40 = vpop.xlane.xlu0 %167  ;;  %v212_v15 = vand.u32 2147483648, %v585_v37  ;;  %vm206_vm7 = vweird.f32 %v585_v37 }
 0x13f   :  { %v395_v41 = vpop.eup %394  ;;  %v165_v43 = vpop.xlane.xlu2 %164  ;;  %v379_v47 = vmul.f32 -1.442695, %v168_v40  ;;  %vm608_vm8 = vcmp.eq.f32.partialorder %v210_v58, 8.507059e+37 }
 0x140   :  { %v397_v44 = vpop.eup %396  ;;  %v588_v46 = vadd.f32 1.0, %v395_v41  ;;  %v378_v50 = vmul.f32 -1.442695, %v165_v43  ;;  %v213_v33 = vor.u32 1.1754944e-38, %v212_v15 }
 0x141   :  { %v399_v48 = vpop.eup %398  ;;  %v232_v49 = vmul.f32 %v397_v44, %v195_v32  ;;  %vm237_vm5 = vweird.f32 %v397_v44 }
 0x142   :  { %v401_v51 = vpop.eup %400  ;;  %v217_v54 = vmul.f32 %v399_v48, %v194_v35  ;;  %406 = vrcp.f32 %v588_v46  ;;  %vm222_vm6 = vweird.f32 %v399_v48  ;;  %vm238_vm9 = vmor %vm236_vm1, %vm237_vm5  ;;  %v285_v25 = vand.u32 2147483647, %v588_v46 }
 0x143   :  { %v403_v55 = vpop.eup %402  ;;  %v233_v56 = vsub.f32 1.0, %v232_v49  ;;  %v600_v59 = vadd.f32 1.0, %v401_v51  ;;  %408 = vpow2.f32 %v379_v47  ;;  %v287_v26 = vand.u32 2147483648, %v588_v46  ;;  %vm223_vm10 = vmor %vm221_vm2, %vm222_vm6 }
 0x144   :  { %v405_v60 = vpop.eup %404  ;;  %v218_v61 = vsub.f32 1.0, %v217_v54  ;;  %v602_v63 = vadd.f32 1.0, %v403_v55  ;;  %410 = vpow2.f32 %v378_v50  ;;  %vm281_vm12 = vweird.f32 %v588_v46 }
 0x145   :  { %v234_v3 = vmul.f32 %v397_v44, %v233_v56  ;;  %v202_v7 = vmul.f32 %v405_v60, %v585_v37  ;;  %412 = vrcp.f32 %v600_v59  ;;  %vm207_vm11 = vweird.f32 %v405_v60 }
 0x146   :  { %v219_v8 = vmul.f32 %v399_v48, %v218_v61  ;;  %414 = vrcp.f32 %v602_v63  ;;  %vm208_vm13 = vmor %vm206_vm7, %vm207_vm11  ;;  %vm630_vm14 = vcmp.eq.f32.partialorder %v285_v25, 8.507059e+37  ;;  %vm266_vm0 = vweird.f32 %v600_v59 }
 0x147   :  { %v235_v16 = vadd.f32 %v397_v44, %v234_v3  ;;  %v203_v17 = vsub.f32 1.0, %v202_v7  ;;  %v272_v54 = vand.u32 2147483648, %v600_v59  ;;  %v255_v57 = vand.u32 2147483647, %v602_v63 }
 0x148   :  { %v407_v23 = vpop.eup %406  ;;  %v220_v24 = vadd.f32 %v399_v48, %v219_v8  ;;  %v257_v58 = vand.u32 2147483648, %v602_v63  ;;  %vm251_vm6 = vweird.f32 %v602_v63 }
 0x149   :  { %v239_v27 = vsel %vm238_vm9, %v397_v44, %v235_v16  ;;  %v204_v28 = vmul.f32 %v405_v60, %v203_v17  ;;  %v277_v29 = vmul.f32 %v407_v23, %v588_v46  ;;  %v409_v30 = vpop.eup %408  ;;  %vm282_vm15 = vweird.f32 %v407_v23 }
 0x14a   :  { %v244_v31 = vsel %vm590_vm3, %v243_v53, %v239_v27  ;;  %v224_v32 = vsel %vm223_vm10, %v399_v48, %v220_v24  ;;  %v411_v34 = vpop.eup %410  ;;  %v637_v48 = vadd.f32 1.0, %v409_v30  ;;  %vm283_vm1 = vmor %vm281_vm12, %vm282_vm15  ;;  %v273_v7 = vor.u32 1.1754944e-38, %v272_v54 }
 0x14b   :  { %v325_v36 = vmul.f32 %v244_v31, %v507_v5  ;;  %v326_v38 = vmul.f32 %v244_v31, %v509_v6  ;;  %v229_v35 = vsel %vm595_vm4, %v228_v62, %v224_v32  ;;  %v205_v39 = vadd.f32 %v405_v60, %v204_v28  ;;  %v413_v40 = vpop.eup %412 }
 0x14c   :  { %v323_v41 = vmul.f32 %v229_v35, %v519_v11  ;;  %v324_v42 = vmul.f32 %v229_v35, %v521_v12  ;;  %v278_v43 = vsub.f32 1.0, %v277_v29  ;;  %v288_v6 = vor.u32 1.1754944e-38, %v287_v26  ;;  %v415_v47 = vpop.eup %414 }
 0x14d   :  { %341 = vst [vmem:[#allocation5 + $0x20] sm:$0xff] %v325_v36  ;;  %v209_v5 = vsel %vm208_vm13, %v405_v60, %v205_v39  ;;  %v262_v45 = vmul.f32 %v413_v40, %v600_v59  ;;  %v639_v37 = vadd.f32 1.0, %v411_v34  ;;  %v247_v52 = vmul.f32 %v415_v47, %v602_v63 }
 0x14e   :  { %342 = vst [vmem:[#allocation5 + $0x28] sm:$0xff] %v326_v38  ;;  %v214_v11 = vsel %vm608_vm8, %v213_v33, %v209_v5  ;;  %v279_v12 = vmul.f32 %v407_v23, %v278_v43  ;;  %416 = vrcp.f32 %v637_v48  ;;  %vm267_vm2 = vweird.f32 %v413_v40 }
 0x14f   :  { %339 = vst [vmem:[#allocation5 + $0x10] sm:$0xff] %v323_v41  ;;  %v321_v49 = vmul.f32 %v214_v11, %v501_v2  ;;  %v322_v50 = vmul.f32 %v214_v11, %v505_v4  ;;  %v263_v51 = vsub.f32 1.0, %v262_v45  ;;  %v270_v2 = vand.u32 2147483647, %v600_v59  ;;  %vm268_vm4 = vmor %vm266_vm0, %vm267_vm2 }
 0x150   :  { %340 = vst [vmem:[#allocation5 + $0x18] sm:$0xff] %v324_v42  ;;  %v280_v53 = vadd.f32 %v407_v23, %v279_v12  ;;  %v248_v4 = vsub.f32 1.0, %v247_v52  ;;  %418 = vrcp.f32 %v639_v37  ;;  %vm252_vm3 = vweird.f32 %v415_v47 }
 0x151   :  { %337 = vst [vmem:[#allocation5] sm:$0xff] %v321_v49  ;;  %v264_v55 = vmul.f32 %v413_v40, %v263_v51  ;;  %vm271_vm5 = vcmp.eq.f32.partialorder %v270_v2, 8.507059e+37  ;;  %vm253_vm7 = vmor %vm251_vm6, %vm252_vm3  ;;  %vm256_vm8 = vcmp.eq.f32.partialorder %v255_v57, 8.507059e+37  ;;  %v258_v22 = vor.u32 1.1754944e-38, %v257_v58 }
 0x152   :  { %338 = vst [vmem:[#allocation5 + $0x8] sm:$0xff] %v322_v50  ;;  %v284_v56 = vsel %vm283_vm1, %v407_v23, %v280_v53  ;;  %v249_v62 = vmul.f32 %v415_v47, %v248_v4  ;;  %v317_v29 = vand.u32 2147483648, %v637_v48  ;;  %vm311_vm10 = vweird.f32 %v637_v48 }
 0x153   :  { %v289_v60 = vsel %vm630_vm14, %v288_v6, %v284_v56  ;;  %v265_v61 = vadd.f32 %v413_v40, %v264_v55  ;;  %v302_v31 = vand.u32 2147483648, %v639_v37  ;;  %vm296_vm14 = vweird.f32 %v639_v37 }
 0x154   :  { %v331_v46 = vmul.f32 %v289_v60, %v515_v9  ;;  %v332_v3 = vmul.f32 %v289_v60, %v517_v10  ;;  %v250_v15 = vadd.f32 %v415_v47, %v249_v62  ;;  %v417_v16 = vpop.eup %416  ;;  %v318_v33 = vor.u32 1.1754944e-38, %v317_v29 }
 0x155   :  { %v269_v8 = vsel %vm268_vm4, %v413_v40, %v265_v61  ;;  %v307_v59 = vmul.f32 %v417_v16, %v637_v48  ;;  %vm312_vm9 = vweird.f32 %v417_v16  ;;  %v303_v35 = vor.u32 1.1754944e-38, %v302_v31 }
 0x156   :  { %347 = vst [vmem:[#allocation5 + $0x50] sm:$0xff] %v331_v46  ;;  %v274_v17 = vsel %vm271_vm5, %v273_v7, %v269_v8  ;;  %v254_v23 = vsel %vm253_vm7, %v415_v47, %v250_v15  ;;  %v419_v24 = vpop.eup %418  ;;  %vm313_vm12 = vmor %vm311_vm10, %vm312_vm9 }
 0x157   :  { %348 = vst [vmem:[#allocation5 + $0x58] sm:$0xff] %v332_v3  ;;  %v329_v9 = vmul.f32 %v274_v17, %v497_v0  ;;  %v330_v10 = vmul.f32 %v274_v17, %v499_v1  ;;  %v259_v25 = vsel %vm256_vm8, %v258_v22, %v254_v23  ;;  %v308_v27 = vsub.f32 1.0, %v307_v59 }
 0x158   :  { %v327_v26 = vmul.f32 %v259_v25, %v537_v20  ;;  %v328_v63 = vmul.f32 %v259_v25, %v539_v21  ;;  %v292_v28 = vmul.f32 %v419_v24, %v639_v37  ;;  %v315_v1 = vand.u32 2147483647, %v637_v48 }
 0x159   :  { %345 = vst [vmem:[#allocation5 + $0x40] sm:$0xff] %v329_v9  ;;  %v309_v0 = vmul.f32 %v417_v16, %v308_v27  ;;  %vm297_vm11 = vweird.f32 %v419_v24  ;;  %v300_v21 = vand.u32 2147483647, %v639_v37 }
 0x15a   :  { %346 = vst [vmem:[#allocation5 + $0x48] sm:$0xff] %v330_v10  ;;  %v293_v30 = vsub.f32 1.0, %v292_v28  ;;  %vm316_vm13 = vcmp.eq.f32.partialorder %v315_v1, 8.507059e+37  ;;  %vm298_vm15 = vmor %vm296_vm14, %vm297_vm11 }
 0x15b   :  { %343 = vst [vmem:[#allocation5 + $0x30] sm:$0xff] %v327_v26  ;;  %v310_v20 = vadd.f32 %v417_v16, %v309_v0  ;;  %vm301_vm0 = vcmp.eq.f32.partialorder %v300_v21, 8.507059e+37 }
 0x15c   :  { %344 = vst [vmem:[#allocation5 + $0x38] sm:$0xff] %v328_v63  ;;  %v294_v32 = vmul.f32 %v419_v24, %v293_v30 }
 0x15d   :  { %v314_v34 = vsel %vm313_vm12, %v417_v16, %v310_v20 }
 0x15e   :  { %v295_v36 = vadd.f32 %v419_v24, %v294_v32  ;;  %v319_v38 = vsel %vm316_vm13, %v318_v33, %v314_v34 }
 0x15f   :  { %v335_v39 = vmul.f32 %v319_v38, %v533_v18  ;;  %v336_v40 = vmul.f32 %v319_v38, %v535_v19 }
 0x160   :  { %v299_v41 = vsel %vm298_vm15, %v419_v24, %v295_v36 }
 0x161   :  { %v304_v42 = vsel %vm301_vm0, %v303_v35, %v299_v41  ;;  %351 = vst [vmem:[#allocation5 + $0x70] sm:$0xff] %v335_v39 }
 0x162   :  { %v333_v43 = vmul.f32 %v304_v42, %v523_v13  ;;  %v334_v44 = vmul.f32 %v304_v42, %v525_v14  ;;  %352 = vst [vmem:[#allocation5 + $0x78] sm:$0xff] %v336_v40 }
 0x164   :  { %349 = vst [vmem:[#allocation5 + $0x60] sm:$0xff] %v333_v43 }
 0x165   :  { %350 = vst [vmem:[#allocation5 + $0x68] sm:$0xff] %v334_v44 }
 0x166   :  { %365 = dma.vmem_to_hbm [thread:$0]  %s358_s3, 2048, %s360_s6, [#allocation4], %s473_s14, %s473_s14, %s474_s15  }
 0x167   :  { %470 = dma.done.wait [#allocation4], 2048  }
 0x168   :  { %471 = vsyncadd [#allocation4], 4294965248 }
 0x169   :  { %370 = vsyncpa [#allocation3], 1 }
 0x16a   :  { %371 = vsyncpa [#allocation4], 1 }

</bundles_post_ra>
